<compile_context>
chip_gen: v7x
topology: tpu7x:2x2x1
jax: 0.10.0
libtpu: 0.0.40
codegen_flags: <defaults>
</compile_context>

<pallas_src>
import math

import jax
import jax.numpy as jnp
import numpy as np
from jax.experimental import pallas as pl
from jax.experimental.pallas import tpu as pltpu

# --- small, module-consistent configuration ---------------------------------
Z_DIM = 32
C_DIM = 16
W_DIM = 32
NUM_WS = 8
NUM_LAYERS = 8
BATCH = 4
EPS = 1e-8
LRELU_SLOPE = 0.01  # torch nn.LeakyReLU() default

# row offsets inside the packed weight slab (all multiples of 8 -> clean sublane slices)
_EW_OFF = 0                      # embed EqualizedLinear  (C_DIM rows)
_LW_OFF = _EW_OFF + C_DIM        # embed nn.Linear        (W_DIM rows)
_W0_OFF = _LW_OFF + W_DIM        # fc0                    (Z_DIM + W_DIM rows)
_FC_OFF = _W0_OFF + Z_DIM + W_DIM  # fc1..fc7             (W_DIM rows each)
_W_ROWS = _FC_OFF + (NUM_LAYERS - 1) * W_DIM  # 336 total


def _leaky(x):
    return jnp.where(x >= 0, x, LRELU_SLOPE * x)


# --- Pallas kernel: entire mapping network, fully VMEM-resident --------------
def mapping_kernel(z_ref, c_ref, w_ref, b_ref, out_ref):
    bias = b_ref[...]  # (NUM_LAYERS + 2, W_DIM)

    # normalize_2nd_moment(z)
    z = z_ref[...]
    xz = z * jax.lax.rsqrt(jnp.mean(z * z, axis=1, keepdims=True) + EPS)

    # embed(c) = nn.Linear(EqualizedLinear(c)), then normalize_2nd_moment
    c = c_ref[...]
    y = jnp.dot(c, w_ref[_EW_OFF:_EW_OFF + C_DIM, :],
                preferred_element_type=jnp.float32) + bias[0:1, :]
    y = jnp.dot(y, w_ref[_LW_OFF:_LW_OFF + W_DIM, :],
                preferred_element_type=jnp.float32) + bias[1:2, :]
    xy = y * jax.lax.rsqrt(jnp.mean(y * y, axis=1, keepdims=True) + EPS)

    # fc0 on the concat [xz, xy] (single fused dot, K = Z_DIM + W_DIM = 64)
    x = jnp.concatenate([xz, xy], axis=1)
    x = _leaky(jnp.dot(x, w_ref[_W0_OFF:_W0_OFF + Z_DIM + W_DIM, :],
                       preferred_element_type=jnp.float32) + bias[2:3, :])

    # fc1 .. fc{num_layers-1}
    for i in range(NUM_LAYERS - 1):
        r0 = _FC_OFF + i * W_DIM
        x = _leaky(jnp.dot(x, w_ref[r0:r0 + W_DIM, :],
                           preferred_element_type=jnp.float32)
                   + bias[3 + i:4 + i, :])

    out_ref[...] = x

    # TODO(synk): w_avg EMA update (update_emas=True) and truncation_psi != 1
    # paths are stateful / disabled by default args and are not implemented.


# --- parameter construction (deterministic, EqualizedWeight scaling) ---------
def make_params(key):
    keys = jax.random.split(key, 4 + NUM_LAYERS)

    def eq_weight(k, out_f, in_f):
        # EqualizedWeight: randn([out, in]) * 1/sqrt(in); pre-transpose -> (in, out)
        w = jax.random.normal(k, (out_f, in_f), jnp.float32) / math.sqrt(in_f)
        return jnp.transpose(w)

    weights = []
    biases = []

    # embed: EqualizedLinear(C_DIM, W_DIM) then nn.Linear(W_DIM, W_DIM)
    weights.append(eq_weight(keys[0], W_DIM, C_DIM))                 # ew (C, W)
    biases.append(jnp.zeros((W_DIM,), jnp.float32))                  # eb
    bound = 1.0 / math.sqrt(W_DIM)
    weights.append(jnp.transpose(
        jax.random.uniform(keys[1], (W_DIM, W_DIM), jnp.float32, -bound, bound)))  # lw
    biases.append(jax.random.uniform(
        keys[2], (W_DIM,), jnp.float32, -bound, bound))              # lb

    # fc0: in = Z_DIM + W_DIM, out = W_DIM (kept whole)
    weights.append(eq_weight(keys[3], W_DIM, Z_DIM + W_DIM))         # w0 (Z+W, W)
    biases.append(jnp.zeros((W_DIM,), jnp.float32))                  # b0

    # fc1 .. fc7: (W_DIM -> W_DIM)
    for i in range(NUM_LAYERS - 1):
        weights.append(eq_weight(keys[4 + i], W_DIM, W_DIM))         # wi (W, W)
        biases.append(jnp.zeros((W_DIM,), jnp.float32))              # bi

    w_slab = jnp.concatenate(weights, axis=0)                        # (336, W_DIM)
    b_slab = jnp.stack(biases, axis=0)                               # (10, W_DIM)
    assert w_slab.shape == (_W_ROWS, W_DIM)
    return w_slab, b_slab


# --- wrapper ------------------------------------------------------------------
def mapping_network(z, c, w_slab, b_slab):
    vmem = pl.BlockSpec(memory_space=pltpu.MemorySpace.VMEM)
    x = pl.pallas_call(
        mapping_kernel,
        out_shape=jax.ShapeDtypeStruct((BATCH, W_DIM), jnp.float32),
        in_specs=[vmem, vmem, vmem, vmem],
        out_specs=vmem,
    )(z, c, w_slab, b_slab)
    # x.unsqueeze(1).repeat([1, num_ws, 1]) -> done outside the kernel
    return jnp.broadcast_to(x[:, None, :], (BATCH, NUM_WS, W_DIM))


# --- pure-JAX reference for verification -------------------------------------
def reference(z, c, w_slab, b_slab):
    xz = z * jax.lax.rsqrt(jnp.mean(z * z, axis=1, keepdims=True) + EPS)
    y = jnp.dot(c, w_slab[_EW_OFF:_EW_OFF + C_DIM, :],
                preferred_element_type=jnp.float32) + b_slab[0:1, :]
    y = jnp.dot(y, w_slab[_LW_OFF:_LW_OFF + W_DIM, :],
                preferred_element_type=jnp.float32) + b_slab[1:2, :]
    xy = y * jax.lax.rsqrt(jnp.mean(y * y, axis=1, keepdims=True) + EPS)
    x = jnp.concatenate([xz, xy], axis=1)
    x = _leaky(jnp.dot(x, w_slab[_W0_OFF:_W0_OFF + Z_DIM + W_DIM, :],
                       preferred_element_type=jnp.float32) + b_slab[2:3, :])
    for i in range(NUM_LAYERS - 1):
        r0 = _FC_OFF + i * W_DIM
        x = _leaky(jnp.dot(x, w_slab[r0:r0 + W_DIM, :],
                           preferred_element_type=jnp.float32)
                   + b_slab[3 + i:4 + i, :])
    return jnp.broadcast_to(x[:, None, :], (BATCH, NUM_WS, W_DIM))


if __name__ == "__main__":
    key = jax.random.PRNGKey(0)
    kz, kc, kp = jax.random.split(key, 3)
    z = jax.random.normal(kz, (BATCH, Z_DIM), jnp.float32)
    c = jax.random.normal(kc, (BATCH, C_DIM), jnp.float32)
    w_slab, b_slab = make_params(kp)

    out = mapping_network(z, c, w_slab, b_slab)
    out = jax.block_until_ready(out)

    ref = jax.block_until_ready(reference(z, c, w_slab, b_slab))
    np.testing.assert_allclose(np.asarray(out), np.asarray(ref), rtol=1e-5, atol=1e-5)
    assert out.shape == (BATCH, NUM_WS, W_DIM)
    print("KERNEL_OK")
</pallas_src>

<mosaic_0001>
module attributes {stable_mosaic.version = 11 : i64} {
  func.func @mapping_kernel(%arg0: memref<4x32xf32, #tpu.memory_space<vmem>>, %arg1: memref<4x16xf32, #tpu.memory_space<vmem>>, %arg2: memref<336x32xf32, #tpu.memory_space<vmem>>, %arg3: memref<10x32xf32, #tpu.memory_space<vmem>>, %arg4: memref<4x32xf32, #tpu.memory_space<vmem>>) attributes {dimension_semantics = [], scalar_prefetch = 0 : i64, scratch_operands = 0 : i64, tpu.core_type = #tpu.core_type<tc>} {
    %c0 = arith.constant 0 : index
    %c0_0 = arith.constant 0 : index
    %0 = vector.load %arg3[%c0, %c0_0] : memref<10x32xf32, #tpu.memory_space<vmem>>, vector<10x32xf32>
    %c0_1 = arith.constant 0 : index
    %c0_2 = arith.constant 0 : index
    %1 = vector.load %arg0[%c0_1, %c0_2] : memref<4x32xf32, #tpu.memory_space<vmem>>, vector<4x32xf32>
    %2 = arith.mulf %1, %1 : vector<4x32xf32>
    %cst = arith.constant dense<0.000000e+00> : vector<4xf32>
    %3 = vector.multi_reduction <add>, %2, %cst [1] : vector<4x32xf32> to vector<4xf32>
    %4 = vector.shape_cast %3 : vector<4xf32> to vector<4x1xf32>
    %cst_3 = arith.constant 3.200000e+01 : f32
    %5 = vector.broadcast %cst_3 : f32 to vector<4x1xf32>
    %6 = arith.divf %4, %5 : vector<4x1xf32>
    %cst_4 = arith.constant 9.99999993E-9 : f32
    %7 = vector.broadcast %cst_4 : f32 to vector<4x1xf32>
    %8 = arith.addf %6, %7 : vector<4x1xf32>
    %9 = math.rsqrt %8 : vector<4x1xf32>
    %10 = vector.broadcast %9 : vector<4x1xf32> to vector<4x32xf32>
    %11 = arith.mulf %1, %10 : vector<4x32xf32>
    %c0_5 = arith.constant 0 : index
    %c0_6 = arith.constant 0 : index
    %12 = vector.load %arg1[%c0_5, %c0_6] : memref<4x16xf32, #tpu.memory_space<vmem>>, vector<4x16xf32>
    %c0_7 = arith.constant 0 : index
    %c0_8 = arith.constant 0 : index
    %13 = vector.load %arg2[%c0_7, %c0_8] : memref<336x32xf32, #tpu.memory_space<vmem>>, vector<16x32xf32>
    %cst_9 = arith.constant dense<0.000000e+00> : vector<4x32xf32>
    %14 = tpu.matmul %12, %13, %cst_9 {dimension_numbers = #tpu.dot_dimension_numbers<[1], [0], [0], [1], [0, 0, 1, 1], [], []>} : vector<4x16xf32>, vector<16x32xf32>, vector<4x32xf32> -> vector<4x32xf32>
    %15 = vector.extract_strided_slice %0 {offsets = [0, 0], sizes = [1, 32], strides = [1, 1]} : vector<10x32xf32> to vector<1x32xf32>
    %16 = vector.broadcast %15 : vector<1x32xf32> to vector<4x32xf32>
    %17 = arith.addf %14, %16 : vector<4x32xf32>
    %c16 = arith.constant 16 : index
    %c0_10 = arith.constant 0 : index
    %18 = vector.load %arg2[%c16, %c0_10] : memref<336x32xf32, #tpu.memory_space<vmem>>, vector<32x32xf32>
    %cst_11 = arith.constant dense<0.000000e+00> : vector<4x32xf32>
    %19 = tpu.matmul %17, %18, %cst_11 {dimension_numbers = #tpu.dot_dimension_numbers<[1], [0], [0], [1], [0, 0, 1, 1], [], []>} : vector<4x32xf32>, vector<32x32xf32>, vector<4x32xf32> -> vector<4x32xf32>
    %20 = vector.extract_strided_slice %0 {offsets = [1, 0], sizes = [1, 32], strides = [1, 1]} : vector<10x32xf32> to vector<1x32xf32>
    %21 = vector.broadcast %20 : vector<1x32xf32> to vector<4x32xf32>
    %22 = arith.addf %19, %21 : vector<4x32xf32>
    %23 = arith.mulf %22, %22 : vector<4x32xf32>
    %cst_12 = arith.constant dense<0.000000e+00> : vector<4xf32>
    %24 = vector.multi_reduction <add>, %23, %cst_12 [1] : vector<4x32xf32> to vector<4xf32>
    %25 = vector.shape_cast %24 : vector<4xf32> to vector<4x1xf32>
    %cst_13 = arith.constant 3.200000e+01 : f32
    %26 = vector.broadcast %cst_13 : f32 to vector<4x1xf32>
    %27 = arith.divf %25, %26 : vector<4x1xf32>
    %cst_14 = arith.constant 9.99999993E-9 : f32
    %28 = vector.broadcast %cst_14 : f32 to vector<4x1xf32>
    %29 = arith.addf %27, %28 : vector<4x1xf32>
    %30 = math.rsqrt %29 : vector<4x1xf32>
    %31 = vector.broadcast %30 : vector<4x1xf32> to vector<4x32xf32>
    %32 = arith.mulf %22, %31 : vector<4x32xf32>
    %33 = tpu.concatenate %11, %32 in 1 : vector<4x32xf32>, vector<4x32xf32> -> vector<4x64xf32>
    %c48 = arith.constant 48 : index
    %c0_15 = arith.constant 0 : index
    %34 = vector.load %arg2[%c48, %c0_15] : memref<336x32xf32, #tpu.memory_space<vmem>>, vector<64x32xf32>
    %cst_16 = arith.constant dense<0.000000e+00> : vector<4x32xf32>
    %35 = tpu.matmul %33, %34, %cst_16 {dimension_numbers = #tpu.dot_dimension_numbers<[1], [0], [0], [1], [0, 0, 1, 1], [], []>} : vector<4x64xf32>, vector<64x32xf32>, vector<4x32xf32> -> vector<4x32xf32>
    %36 = vector.extract_strided_slice %0 {offsets = [2, 0], sizes = [1, 32], strides = [1, 1]} : vector<10x32xf32> to vector<1x32xf32>
    %37 = vector.broadcast %36 : vector<1x32xf32> to vector<4x32xf32>
    %38 = arith.addf %35, %37 : vector<4x32xf32>
    %cst_17 = arith.constant 0.000000e+00 : f32
    %39 = vector.broadcast %cst_17 : f32 to vector<4x32xf32>
    %40 = arith.cmpf oge, %38, %39 : vector<4x32xf32>
    %cst_18 = arith.constant 0.00999999977 : f32
    %41 = vector.broadcast %cst_18 : f32 to vector<4x32xf32>
    %42 = arith.mulf %41, %38 : vector<4x32xf32>
    %43 = arith.select %40, %38, %42 : vector<4x32xi1>, vector<4x32xf32>
    %c112 = arith.constant 112 : index
    %c0_19 = arith.constant 0 : index
    %44 = vector.load %arg2[%c112, %c0_19] : memref<336x32xf32, #tpu.memory_space<vmem>>, vector<32x32xf32>
    %cst_20 = arith.constant dense<0.000000e+00> : vector<4x32xf32>
    %45 = tpu.matmul %43, %44, %cst_20 {dimension_numbers = #tpu.dot_dimension_numbers<[1], [0], [0], [1], [0, 0, 1, 1], [], []>} : vector<4x32xf32>, vector<32x32xf32>, vector<4x32xf32> -> vector<4x32xf32>
    %46 = vector.extract_strided_slice %0 {offsets = [3, 0], sizes = [1, 32], strides = [1, 1]} : vector<10x32xf32> to vector<1x32xf32>
    %47 = vector.broadcast %46 : vector<1x32xf32> to vector<4x32xf32>
    %48 = arith.addf %45, %47 : vector<4x32xf32>
    %cst_21 = arith.constant 0.000000e+00 : f32
    %49 = vector.broadcast %cst_21 : f32 to vector<4x32xf32>
    %50 = arith.cmpf oge, %48, %49 : vector<4x32xf32>
    %cst_22 = arith.constant 0.00999999977 : f32
    %51 = vector.broadcast %cst_22 : f32 to vector<4x32xf32>
    %52 = arith.mulf %51, %48 : vector<4x32xf32>
    %53 = arith.select %50, %48, %52 : vector<4x32xi1>, vector<4x32xf32>
    %c144 = arith.constant 144 : index
    %c0_23 = arith.constant 0 : index
    %54 = vector.load %arg2[%c144, %c0_23] : memref<336x32xf32, #tpu.memory_space<vmem>>, vector<32x32xf32>
    %cst_24 = arith.constant dense<0.000000e+00> : vector<4x32xf32>
    %55 = tpu.matmul %53, %54, %cst_24 {dimension_numbers = #tpu.dot_dimension_numbers<[1], [0], [0], [1], [0, 0, 1, 1], [], []>} : vector<4x32xf32>, vector<32x32xf32>, vector<4x32xf32> -> vector<4x32xf32>
    %56 = vector.extract_strided_slice %0 {offsets = [4, 0], sizes = [1, 32], strides = [1, 1]} : vector<10x32xf32> to vector<1x32xf32>
    %57 = vector.broadcast %56 : vector<1x32xf32> to vector<4x32xf32>
    %58 = arith.addf %55, %57 : vector<4x32xf32>
    %cst_25 = arith.constant 0.000000e+00 : f32
    %59 = vector.broadcast %cst_25 : f32 to vector<4x32xf32>
    %60 = arith.cmpf oge, %58, %59 : vector<4x32xf32>
    %cst_26 = arith.constant 0.00999999977 : f32
    %61 = vector.broadcast %cst_26 : f32 to vector<4x32xf32>
    %62 = arith.mulf %61, %58 : vector<4x32xf32>
    %63 = arith.select %60, %58, %62 : vector<4x32xi1>, vector<4x32xf32>
    %c176 = arith.constant 176 : index
    %c0_27 = arith.constant 0 : index
    %64 = vector.load %arg2[%c176, %c0_27] : memref<336x32xf32, #tpu.memory_space<vmem>>, vector<32x32xf32>
    %cst_28 = arith.constant dense<0.000000e+00> : vector<4x32xf32>
    %65 = tpu.matmul %63, %64, %cst_28 {dimension_numbers = #tpu.dot_dimension_numbers<[1], [0], [0], [1], [0, 0, 1, 1], [], []>} : vector<4x32xf32>, vector<32x32xf32>, vector<4x32xf32> -> vector<4x32xf32>
    %66 = vector.extract_strided_slice %0 {offsets = [5, 0], sizes = [1, 32], strides = [1, 1]} : vector<10x32xf32> to vector<1x32xf32>
    %67 = vector.broadcast %66 : vector<1x32xf32> to vector<4x32xf32>
    %68 = arith.addf %65, %67 : vector<4x32xf32>
    %cst_29 = arith.constant 0.000000e+00 : f32
    %69 = vector.broadcast %cst_29 : f32 to vector<4x32xf32>
    %70 = arith.cmpf oge, %68, %69 : vector<4x32xf32>
    %cst_30 = arith.constant 0.00999999977 : f32
    %71 = vector.broadcast %cst_30 : f32 to vector<4x32xf32>
    %72 = arith.mulf %71, %68 : vector<4x32xf32>
    %73 = arith.select %70, %68, %72 : vector<4x32xi1>, vector<4x32xf32>
    %c208 = arith.constant 208 : index
    %c0_31 = arith.constant 0 : index
    %74 = vector.load %arg2[%c208, %c0_31] : memref<336x32xf32, #tpu.memory_space<vmem>>, vector<32x32xf32>
    %cst_32 = arith.constant dense<0.000000e+00> : vector<4x32xf32>
    %75 = tpu.matmul %73, %74, %cst_32 {dimension_numbers = #tpu.dot_dimension_numbers<[1], [0], [0], [1], [0, 0, 1, 1], [], []>} : vector<4x32xf32>, vector<32x32xf32>, vector<4x32xf32> -> vector<4x32xf32>
    %76 = vector.extract_strided_slice %0 {offsets = [6, 0], sizes = [1, 32], strides = [1, 1]} : vector<10x32xf32> to vector<1x32xf32>
    %77 = vector.broadcast %76 : vector<1x32xf32> to vector<4x32xf32>
    %78 = arith.addf %75, %77 : vector<4x32xf32>
    %cst_33 = arith.constant 0.000000e+00 : f32
    %79 = vector.broadcast %cst_33 : f32 to vector<4x32xf32>
    %80 = arith.cmpf oge, %78, %79 : vector<4x32xf32>
    %cst_34 = arith.constant 0.00999999977 : f32
    %81 = vector.broadcast %cst_34 : f32 to vector<4x32xf32>
    %82 = arith.mulf %81, %78 : vector<4x32xf32>
    %83 = arith.select %80, %78, %82 : vector<4x32xi1>, vector<4x32xf32>
    %c240 = arith.constant 240 : index
    %c0_35 = arith.constant 0 : index
    %84 = vector.load %arg2[%c240, %c0_35] : memref<336x32xf32, #tpu.memory_space<vmem>>, vector<32x32xf32>
    %cst_36 = arith.constant dense<0.000000e+00> : vector<4x32xf32>
    %85 = tpu.matmul %83, %84, %cst_36 {dimension_numbers = #tpu.dot_dimension_numbers<[1], [0], [0], [1], [0, 0, 1, 1], [], []>} : vector<4x32xf32>, vector<32x32xf32>, vector<4x32xf32> -> vector<4x32xf32>
    %86 = vector.extract_strided_slice %0 {offsets = [7, 0], sizes = [1, 32], strides = [1, 1]} : vector<10x32xf32> to vector<1x32xf32>
    %87 = vector.broadcast %86 : vector<1x32xf32> to vector<4x32xf32>
    %88 = arith.addf %85, %87 : vector<4x32xf32>
    %cst_37 = arith.constant 0.000000e+00 : f32
    %89 = vector.broadcast %cst_37 : f32 to vector<4x32xf32>
    %90 = arith.cmpf oge, %88, %89 : vector<4x32xf32>
    %cst_38 = arith.constant 0.00999999977 : f32
    %91 = vector.broadcast %cst_38 : f32 to vector<4x32xf32>
    %92 = arith.mulf %91, %88 : vector<4x32xf32>
    %93 = arith.select %90, %88, %92 : vector<4x32xi1>, vector<4x32xf32>
    %c272 = arith.constant 272 : index
    %c0_39 = arith.constant 0 : index
    %94 = vector.load %arg2[%c272, %c0_39] : memref<336x32xf32, #tpu.memory_space<vmem>>, vector<32x32xf32>
    %cst_40 = arith.constant dense<0.000000e+00> : vector<4x32xf32>
    %95 = tpu.matmul %93, %94, %cst_40 {dimension_numbers = #tpu.dot_dimension_numbers<[1], [0], [0], [1], [0, 0, 1, 1], [], []>} : vector<4x32xf32>, vector<32x32xf32>, vector<4x32xf32> -> vector<4x32xf32>
    %96 = vector.extract_strided_slice %0 {offsets = [8, 0], sizes = [1, 32], strides = [1, 1]} : vector<10x32xf32> to vector<1x32xf32>
    %97 = vector.broadcast %96 : vector<1x32xf32> to vector<4x32xf32>
    %98 = arith.addf %95, %97 : vector<4x32xf32>
    %cst_41 = arith.constant 0.000000e+00 : f32
    %99 = vector.broadcast %cst_41 : f32 to vector<4x32xf32>
    %100 = arith.cmpf oge, %98, %99 : vector<4x32xf32>
    %cst_42 = arith.constant 0.00999999977 : f32
    %101 = vector.broadcast %cst_42 : f32 to vector<4x32xf32>
    %102 = arith.mulf %101, %98 : vector<4x32xf32>
    %103 = arith.select %100, %98, %102 : vector<4x32xi1>, vector<4x32xf32>
    %c304 = arith.constant 304 : index
    %c0_43 = arith.constant 0 : index
    %104 = vector.load %arg2[%c304, %c0_43] : memref<336x32xf32, #tpu.memory_space<vmem>>, vector<32x32xf32>
    %cst_44 = arith.constant dense<0.000000e+00> : vector<4x32xf32>
    %105 = tpu.matmul %103, %104, %cst_44 {dimension_numbers = #tpu.dot_dimension_numbers<[1], [0], [0], [1], [0, 0, 1, 1], [], []>} : vector<4x32xf32>, vector<32x32xf32>, vector<4x32xf32> -> vector<4x32xf32>
    %106 = vector.extract_strided_slice %0 {offsets = [9, 0], sizes = [1, 32], strides = [1, 1]} : vector<10x32xf32> to vector<1x32xf32>
    %107 = vector.broadcast %106 : vector<1x32xf32> to vector<4x32xf32>
    %108 = arith.addf %105, %107 : vector<4x32xf32>
    %cst_45 = arith.constant 0.000000e+00 : f32
    %109 = vector.broadcast %cst_45 : f32 to vector<4x32xf32>
    %110 = arith.cmpf oge, %108, %109 : vector<4x32xf32>
    %cst_46 = arith.constant 0.00999999977 : f32
    %111 = vector.broadcast %cst_46 : f32 to vector<4x32xf32>
    %112 = arith.mulf %111, %108 : vector<4x32xf32>
    %113 = arith.select %110, %108, %112 : vector<4x32xi1>, vector<4x32xf32>
    %c0_47 = arith.constant 0 : index
    %c0_48 = arith.constant 0 : index
    %114 = vector.load %arg4[%c0_47, %c0_48] : memref<4x32xf32, #tpu.memory_space<vmem>>, vector<4x32xf32>
    tpu.vector_store %arg4[%c0_47, %c0_48], %113 {strides = array<i32>} : memref<4x32xf32, #tpu.memory_space<vmem>>, vector<4x32xf32>,
    return
  }
}

</mosaic_0001>

<bundles_post_ra>
// kernel: tpu_custom_call.1
= control target key start
LH: loop header
LB: loop body
LE: loop exit
PB: predicated region body
PF: predicated region fallthrough
CT: control target
= control target key end

     0   :  { %v1171_v2 = vmov 0.0|0.0   ;;  %vm1172_vm0 = vmmov 0   ;;  %v1173_v4 = vmov 0.0   ;;  %s1432_s0 = inlined_call_operand.vmem [shape: f32[4,32], index: 0, kind: input, shape index: {}]   ;;  %s1433_s1 = inlined_call_operand.vmem [shape: f32[4,16], index: 1, kind: input, shape index: {}]   ;;  %s1434_s2 = inlined_call_operand.vmem [shape: f32[336,32], index: 2, kind: input, shape index: {}]   ;;  %s1435_s3 = inlined_call_operand.vmem [shape: f32[10,32], index: 3, kind: input, shape index: {}]   ;;  %s1436_s4 = inlined_call_operand.hbm [shape: f32[4,32], index: 4, kind: output, shape index: {}]  }
   0x1   :  { %v32_v0 = vld [vmem:[%s1434_s2] sm:$0xff]  ;;  %v33_v1 = vld [vmem:[%s1434_s2 + $0x8] sm:$0xff]  ;;  %1075 = vmatprep.subr.bf16.mxu0 %v1171_v2  ;;  %965 = vmatprep.mubr.msk.f32.mxu0 %vm1172_vm0, %v1173_v4  ;;  %v112_v5 = vld [vmem:[%s1434_s2 + $0x10] sm:$0xff] }
   0x2   :  { %v1076_v3 = vpack.c.bf16 %v33_v1, %v32_v0  ;;  %v113_v6 = vld [vmem:[%s1434_s2 + $0x18] sm:$0xff]  ;;  %1078 = vmatprep.subr.bf16.mxu1 %v1171_v2  ;;  %976 = vmatprep.mubr.msk.f32.mxu1 %vm1172_vm0, %v1173_v4 }
   0x3   :  { %v1079_v7 = vpack.c.bf16 %v113_v6, %v112_v5 }
   0x4   :  { %9 = vsyncpa [#allocation3], 0  ;;  %1077 = vmatpush3.bf16.msra.mxu0 %v1076_v3  ;;  %v31_v8 = vld [vmem:[%s1433_s1] sm:$0xf]  ;;  %vm38_vm1 = vcmask 130048   ;;  %v115_v10 = vld [vmem:[%s1434_s2 + $0x28] sm:$0xff]  ;;  %v34_v12 = vlaneseq }
   0x5   :  { %1080 = vmatpush3.bf16.msra.mxu1 %v1079_v7  ;;  %1084 = vmatprep.subr.bf16.mxu0 %v1171_v2  ;;  %v114_v9 = vld [vmem:[%s1434_s2 + $0x20] sm:$0xff]  ;;  %vm120_vm2 = vcmask 261120   ;;  %vm22_vm3 = vcmask 257024   ;;  %v207_v30 = vld [vmem:[%s1434_s2 + $0x30] sm:$0xff]  ;;  %v208_v31 = vld [vmem:[%s1434_s2 + $0x38] sm:$0xff]  ;;  %s1174_s25 = smov 32  }
   0x6   :  { %1081 = vmatprep.subr.bf16.mxu1 %v1171_v2  ;;  %v1082_v11 = vpack.c.bf16 %v115_v10, %v114_v9  ;;  %v1233_v13 = vshrl.u32 %v34_v12, 7  ;;  %v1239_v15 = vld [vmem:[%s1435_s3] sm:$0xff]  ;;  %v1085_v33 = vpack.c.bf16 %v208_v31, %v207_v30  ;;  %v210_v34 = vld [vmem:[%s1434_s2 + $0x48] sm:$0xff]  ;;  %v211_v36 = vld [vmem:[%s1434_s2 + $0x50] sm:$0xff]  ;;  %vm219_vm4 = vcmask 523264  }
   0x7   :  { %966 = vmatmul.mubr.msk.f32.vlgmr.msra.gmra.mrb[0].mxu0 %vm38_vm1, %v31_v8  ;;  %v20_v23 = vld [vmem:[%s1432_s0] sm:$0xf]  ;;  %v212_v37 = vld [vmem:[%s1434_s2 + $0x58] sm:$0xff]  ;;  %v214_v40 = vld [vmem:[%s1434_s2 + $0x68] sm:$0xff] }
   0x8   :  { %995 = vmatprep.mubr.msk.f32.mxu0 %vm1172_vm0, %v1173_v4  ;;  %v36_v14 = vsub.s32 0, %v1233_v13  ;;  %v118_v20 = vsub.s32 1, %v1233_v13  ;;  %v21_v27 = vmul.f32 %v20_v23, %v20_v23  ;;  %v209_v32 = vld [vmem:[%s1434_s2 + $0x40] sm:$0xff]  ;;  %1086 = vmatpush3.bf16.msra.mxu0 %v1085_v33  ;;  %v1091_v38 = vpack.c.bf16 %v212_v37, %v211_v36  ;;  %v296_v45 = vld [vmem:[%s1434_s2 + $0x70] sm:$0xff]  ;;  %v297_v46 = vld [vmem:[%s1434_s2 + $0x78] sm:$0xff] }
   0x9   :  { %1083 = vmatpush3.bf16.msra.mxu1 %v1082_v11  ;;  %v1088_v35 = vpack.c.bf16 %v210_v34, %v209_v32  ;;  %1087 = vmatprep.subr.bf16.mxu0 %v1171_v2  ;;  %v213_v39 = vld [vmem:[%s1434_s2 + $0x60] sm:$0xff]  ;;  %v1097_v47 = vpack.c.bf16 %v297_v46, %v296_v45  ;;  %v299_v58 = vld [vmem:[%s1434_s2 + $0x88] sm:$0xff]  ;;  %v217_v60 = vsub.s32 2, %v1233_v13  ;;  %v380_v63 = vld [vmem:[%s1434_s2 + $0x90] sm:$0xff]  ;;  %v386_v31 = vsub.s32 4, %v1233_v13 }
   0xa   :  { %1096 = vmatprep.subr.bf16.mxu1 %v1171_v2  ;;  %v37_v16 = vrot.slane %v1239_v15, %v36_v14  ;;  %v119_v21 = vrot.slane %v1239_v15, %v118_v20  ;;  %v23_v29 = vsel %vm22_vm3, %v21_v27, 0.0  ;;  %v1094_v41 = vpack.c.bf16 %v214_v40, %v213_v39  ;;  %v298_v57 = vld [vmem:[%s1434_s2 + $0x80] sm:$0xff]  ;;  %v381_v0 = vld [vmem:[%s1434_s2 + $0x98] sm:$0xff]  ;;  %v383_v9 = vld [vmem:[%s1434_s2 + $0xa8] sm:$0xff] }
   0xb   :  { %v1100_v59 = vpack.c.bf16 %v299_v58, %v298_v57  ;;  %v218_v61 = vrot.slane %v1239_v15, %v217_v60  ;;  %v1103_v6 = vpack.c.bf16 %v381_v0, %v380_v63  ;;  %v382_v8 = vld [vmem:[%s1434_s2 + $0xa0] sm:$0xff]  ;;  %v464_v11 = vld [vmem:[%s1434_s2 + $0xb0] sm:$0xff]  ;;  %v465_v12 = vld [vmem:[%s1434_s2 + $0xb8] sm:$0xff]  ;;  %v387_v32 = vrot.slane %v1239_v15, %v386_v31 }
   0xc   :  { %1089 = vmatpush3.bf16.msra.mxu0 %v1088_v35  ;;  %v1106_v10 = vpack.c.bf16 %v383_v9, %v382_v8  ;;  %v551_v39 = vld [vmem:[%s1434_s2 + $0xe8] sm:$0xff]  ;;  %v554_v57 = vsub.s32 6, %v1233_v13  ;;  %v718_v0 = vld [vmem:[%s1434_s2 + $0x120] sm:$0xff] }
   0xd   :  { %1090 = vmatprep.subr.bf16.mxu0 %v1171_v2 }
   0xe   :  { %v555_v58 = vrot.slane %v1239_v15, %v554_v57 }
  0x10   :  { %1092 = vmatpush3.bf16.msra.mxu0 %v1091_v38  ;;  %v550_v38 = vld [vmem:[%s1434_s2 + $0xe0] sm:$0xff] }
  0x11   :  { %1093 = vmatprep.subr.bf16.mxu0 %v1171_v2  ;;  %v1118_v40 = vpack.c.bf16 %v551_v39, %v550_v38 }
  0x14   :  { %1095 = vmatpush3.bf16.msra.mxu0 %v1094_v41  ;;  %v632_v41 = vld [vmem:[%s1434_s2 + $0xf0] sm:$0xff] }
  0x15   :  { %1108 = vmatprep.subr.bf16.mxu0 %v1171_v2 }
  0xda   :  { %v108_v17 = vpop.f32.mrb[0].mxu0 }
  0xdb   :  { %v109_v18 = vadd.f32 %v108_v17, %v37_v16  ;;  %v967_v19 = vpop.f32.mrb[1].mxu0  ;;  %v1109_v16 = vpack.c.bf16 %v465_v12, %v464_v11  ;;  %v302_v17 = vsub.s32 3, %v1233_v13 }
  0xdd   :  { %977 = vmatmul.mubr.msk.f32.vlgmr.msra.gmra.mrb[0].mxu1 %vm120_vm2, %v109_v18  ;;  %v303_v18 = vrot.slane %v1239_v15, %v302_v17  ;;  %v802_v17 = vld [vmem:[%s1434_s2 + $0x140] sm:$0xff] }
  0xde   :  { %1006 = vmatprep.mubr.msk.f32.mxu1 %vm1172_vm0, %v1173_v4  ;;  %1098 = vmatpush3.bf16.msra.mxu1 %v1097_v47 }
  0xdf   :  { %1099 = vmatprep.subr.bf16.mxu1 %v1171_v2 }
  0xe2   :  { %1101 = vmatpush3.bf16.msra.mxu1 %v1100_v59 }
  0xe3   :  { %1102 = vmatprep.subr.bf16.mxu1 %v1171_v2 }
 0x1b0   :  { %v190_v22 = vpop.f32.mrb[0].mxu1 }
 0x1b1   :  { %v191_v24 = vadd.f32 %v190_v22, %v119_v21  ;;  %v978_v25 = vpop.f32.mrb[1].mxu1 }
 0x1b2   :  { %v466_v25 = vld [vmem:[%s1434_s2 + $0xc0] sm:$0xff] }
 0x1b3   :  { %v194_v26 = vmul.f32 %v191_v24, %v191_v24 }
 0x1b5   :  { %v195_v28 = vsel %vm22_vm3, %v194_v26, 0.0  ;;  %v467_v26 = vld [vmem:[%s1434_s2 + $0xc8] sm:$0xff] }
 0x1b6   :  { %196 = vadd.xlane.f32.xlu0 %v195_v28  ;;  %v1112_v27 = vpack.c.bf16 %v467_v26, %v466_v25  ;;  %v548_v28 = vld [vmem:[%s1434_s2 + $0xd0] sm:$0xff] }
 0x1ba   :  { %24 = vadd.xlane.f32.xlu0 %v23_v29  ;;  %v549_v29 = vld [vmem:[%s1434_s2 + $0xd8] sm:$0xff] }
 0x1bb   :  { %v1115_v30 = vpack.c.bf16 %v549_v29, %v548_v28 }
 0x243   :  { %v197_v42 = vpop.xlane.xlu0 %196 }
 0x244   :  { %v198_v43 = vmul.f32 0.03125, %v197_v42  ;;  %v633_v42 = vld [vmem:[%s1434_s2 + $0xf8] sm:$0xff] }
 0x246   :  { %v199_v44 = vadd.f32 1e-08, %v198_v43  ;;  %v1121_v43 = vpack.c.bf16 %v633_v42, %v632_v41 }
 0x247   :  { %v25_v50 = vpop.xlane.xlu0 %24 }
 0x248   :  { %1143 = vrsqrt.f32 %v199_v44  ;;  %v27_v51 = vmul.f32 0.03125, %v25_v50  ;;  %v470_v44 = vsub.s32 5, %v1233_v13 }
 0x24a   :  { %v28_v52 = vadd.f32 1e-08, %v27_v51  ;;  %v471_v45 = vrot.slane %v1239_v15, %v470_v44  ;;  %v634_v51 = vld [vmem:[%s1434_s2 + $0x100] sm:$0xff] }
 0x24c   :  { %1145 = vrsqrt.f32 %v28_v52  ;;  %v635_v52 = vld [vmem:[%s1434_s2 + $0x108] sm:$0xff] }
 0x252   :  { %v1144_v48 = vpop.eup %1143 }
 0x253   :  { %v201_v49 = vmul.f32 %v1144_v48, %v191_v24 }
 0x255   :  { %203 = vrot.lane.b32.xlu1 %v201_v49, %s1174_s25 }
 0x256   :  { %v1146_v53 = vpop.eup %1145 }
 0x257   :  { %v30_v54 = vmul.f32 %v1146_v53, %v20_v23  ;;  %v1124_v53 = vpack.c.bf16 %v635_v52, %v634_v51 }
 0x2c7   :  { %v204_v55 = vpop.permute.xlu1 %203 }
 0x2c8   :  { %v206_v56 = vsel %vm120_vm2, %v30_v54, %v204_v55  ;;  %v716_v54 = vld [vmem:[%s1434_s2 + $0x110] sm:$0xff]  ;;  %v717_v55 = vld [vmem:[%s1434_s2 + $0x118] sm:$0xff] }
 0x2c9   :  { %996 = vmatmul.mubr.msk.f32.vlgmr.msra.gmra.mrb[2].mxu0 %vm219_vm4, %v206_v56  ;;  %v1127_v56 = vpack.c.bf16 %v717_v55, %v716_v54 }
 0x2ca   :  { %1028 = vmatprep.mubr.msk.f32.mxu0 %vm1172_vm0, %v1173_v4  ;;  %1110 = vmatpush3.bf16.msra.mxu0 %v1109_v16 }
 0x2cb   :  { %1111 = vmatprep.subr.bf16.mxu0 %v1171_v2 }
 0x2ce   :  { %1113 = vmatpush3.bf16.msra.mxu0 %v1112_v27 }
 0x2cf   :  { %1120 = vmatprep.subr.bf16.mxu0 %v1171_v2 }
 0x39c   :  { %v289_v62 = vpop.f32.mrb[2].mxu0 }
 0x39d   :  { %v290_v1 = vadd.f32 %v289_v62, %v218_v61  ;;  %v997_v3 = vpop.f32.mrb[3].mxu0 }
 0x39f   :  { %vm293_vm5 = vcmp.ge.f32.partialorder %v290_v1, 0.0  ;;  %v294_v5 = vmul.f32 0.01, %v290_v1 }
 0x3a1   :  { %v295_v7 = vsel %vm293_vm5, %v290_v1, %v294_v5  ;;  %v719_v1 = vld [vmem:[%s1434_s2 + $0x128] sm:$0xff]  ;;  %v800_v5 = vld [vmem:[%s1434_s2 + $0x130] sm:$0xff] }
 0x3a2   :  { %1007 = vmatmul.mubr.msk.f32.vlgmr.msra.gmra.mrb[2].mxu1 %vm120_vm2, %v295_v7  ;;  %v1130_v3 = vpack.c.bf16 %v719_v1, %v718_v0 }
 0x3a3   :  { %1104 = vmatpush3.bf16.msra.mxu1 %v1103_v6  ;;  %1017 = vmatprep.mubr.msk.f32.mxu1 %vm1172_vm0, %v1173_v4  ;;  %v801_v6 = vld [vmem:[%s1434_s2 + $0x138] sm:$0xff] }
 0x3a4   :  { %1105 = vmatprep.subr.bf16.mxu1 %v1171_v2  ;;  %v1133_v7 = vpack.c.bf16 %v801_v6, %v800_v5 }
 0x3a7   :  { %1107 = vmatpush3.bf16.msra.mxu1 %v1106_v10 }
 0x3a8   :  { %1114 = vmatprep.subr.bf16.mxu1 %v1171_v2 }
 0x475   :  { %v373_v19 = vpop.f32.mrb[2].mxu1 }
 0x476   :  { %v374_v21 = vadd.f32 %v373_v19, %v303_v18  ;;  %v1008_v22 = vpop.f32.mrb[3].mxu1 }
 0x478   :  { %vm377_vm6 = vcmp.ge.f32.partialorder %v374_v21, 0.0  ;;  %v378_v23 = vmul.f32 0.01, %v374_v21 }
 0x47a   :  { %v379_v24 = vsel %vm377_vm6, %v374_v21, %v378_v23 }
 0x47b   :  { %1018 = vmatmul.mubr.msk.f32.vlgmr.msra.gmra.mrb[4].mxu1 %vm120_vm2, %v379_v24 }
 0x47c   :  { %1039 = vmatprep.mubr.msk.f32.mxu1 %vm1172_vm0, %v1173_v4  ;;  %1116 = vmatpush3.bf16.msra.mxu1 %v1115_v30 }
 0x47d   :  { %1117 = vmatprep.subr.bf16.mxu1 %v1171_v2 }
 0x480   :  { %1119 = vmatpush3.bf16.msra.mxu1 %v1118_v40 }
 0x481   :  { %1126 = vmatprep.subr.bf16.mxu1 %v1171_v2 }
 0x54e   :  { %v457_v33 = vpop.f32.mrb[4].mxu1 }
 0x54f   :  { %v458_v34 = vadd.f32 %v457_v33, %v387_v32  ;;  %v1019_v35 = vpop.f32.mrb[5].mxu1 }
 0x551   :  { %vm461_vm7 = vcmp.ge.f32.partialorder %v458_v34, 0.0  ;;  %v462_v36 = vmul.f32 0.01, %v458_v34 }
 0x553   :  { %v463_v37 = vsel %vm461_vm7, %v458_v34, %v462_v36 }
 0x554   :  { %1029 = vmatmul.mubr.msk.f32.vlgmr.msra.gmra.mrb[4].mxu0 %vm120_vm2, %v463_v37 }
 0x555   :  { %1050 = vmatprep.mubr.msk.f32.mxu0 %vm1172_vm0, %v1173_v4  ;;  %1122 = vmatpush3.bf16.msra.mxu0 %v1121_v43 }
 0x556   :  { %1123 = vmatprep.subr.bf16.mxu0 %v1171_v2 }
 0x559   :  { %1125 = vmatpush3.bf16.msra.mxu0 %v1124_v53 }
 0x55a   :  { %1132 = vmatprep.subr.bf16.mxu0 %v1171_v2 }
 0x627   :  { %v541_v46 = vpop.f32.mrb[4].mxu0 }
 0x628   :  { %v542_v47 = vadd.f32 %v541_v46, %v471_v45  ;;  %v1030_v48 = vpop.f32.mrb[5].mxu0 }
 0x62a   :  { %vm545_vm8 = vcmp.ge.f32.partialorder %v542_v47, 0.0  ;;  %v546_v49 = vmul.f32 0.01, %v542_v47 }
 0x62c   :  { %v547_v50 = vsel %vm545_vm8, %v542_v47, %v546_v49 }
 0x62d   :  { %1040 = vmatmul.mubr.msk.f32.vlgmr.msra.gmra.mrb[6].mxu1 %vm120_vm2, %v547_v50 }
 0x62e   :  { %1061 = vmatprep.mubr.msk.f32.mxu1 %vm1172_vm0, %v1173_v4  ;;  %1128 = vmatpush3.bf16.msra.mxu1 %v1127_v56 }
 0x62f   :  { %1129 = vmatprep.subr.bf16.mxu1 %v1171_v2 }
 0x632   :  { %1131 = vmatpush3.bf16.msra.mxu1 %v1130_v3 }
 0x700   :  { %v625_v59 = vpop.f32.mrb[6].mxu1 }
 0x701   :  { %v626_v60 = vadd.f32 %v625_v59, %v555_v58  ;;  %v1041_v61 = vpop.f32.mrb[7].mxu1 }
 0x703   :  { %vm629_vm9 = vcmp.ge.f32.partialorder %v626_v60, 0.0  ;;  %v630_v62 = vmul.f32 0.01, %v626_v60 }
 0x705   :  { %v631_v63 = vsel %vm629_vm9, %v626_v60, %v630_v62 }
 0x706   :  { %1051 = vmatmul.mubr.msk.f32.vlgmr.msra.gmra.mrb[6].mxu0 %vm120_vm2, %v631_v63 }
 0x707   :  { %1072 = vmatprep.mubr.msk.f32.mxu0 %vm1172_vm0, %v1173_v4  ;;  %1134 = vmatpush3.bf16.msra.mxu0 %v1133_v7  ;;  %v638_v4 = vsub.s32 7, %v1233_v13 }
 0x708   :  { %1135 = vmatprep.subr.bf16.mxu0 %v1171_v2  ;;  %v803_v2 = vld [vmem:[%s1434_s2 + $0x148] sm:$0xff]  ;;  %s1175_s2 = smov [#allocation2]  }
 0x709   :  { %v639_v8 = vrot.slane %v1239_v15, %v638_v4  ;;  %v1136_v18 = vpack.c.bf16 %v803_v2, %v802_v17  ;;  %v19_v15 = vld [vmem:[%s1435_s3 + $0x8] sm:$0x3]  ;;  %s891_s24 = sshll.u32 %s1175_s2, 4  ;;  %s892_s24 = int_to_ptr.vmem [resolvable:$true] %s891_s24 }
 0x70a   :  { %v723_v19 = vrot.slane %v19_v15, %v36_v14  ;;  %v807_v26 = vrot.slane %v19_v15, %v118_v20  ;;  %s1147_s3 = scalar_lea.vmem %s892_s24, 64  ;;  %p1152_p1 = scmp.lt.s32.totalorder %s892_s24, %s892_s24 }
 0x70b   :  { %1137 = vmatpush3.bf16.msra.mxu0 %v1136_v18  ;;  %p1148_p0 = scmp.ne.s32.totalorder %s892_s24, %s1147_s3  ;;  %p1153_p2 = scmp.lt.s32.totalorder %s1147_s3, %s1147_s3 }
 0x70d   :  { %p1154_p3 = por %p1153_p2, %p1152_p1 }
 0x70f   :  { %p1155_p4 = pnand %p1154_p3, %p1148_p0 }
 0x7d9   :  { %v709_v9 = vpop.f32.mrb[6].mxu0 }
 0x7da   :  { %v710_v10 = vadd.f32 %v709_v9, %v639_v8  ;;  %v1052_v11 = vpop.f32.mrb[7].mxu0 }
 0x7dc   :  { %vm713_vm10 = vcmp.ge.f32.partialorder %v710_v10, 0.0  ;;  %v714_v12 = vmul.f32 0.01, %v710_v10 }
 0x7de   :  { %v715_v16 = vsel %vm713_vm10, %v710_v10, %v714_v12 }
 0x7df   :  { %1062 = vmatmul.mubr.msk.f32.vlgmr.msra.gmra.mrb[8].mxu1 %vm120_vm2, %v715_v16 }
 0x8b2   :  { %v793_v21 = vpop.f32.mrb[8].mxu1 }
 0x8b3   :  { %v794_v22 = vadd.f32 %v793_v21, %v723_v19  ;;  %v1063_v23 = vpop.f32.mrb[9].mxu1 }
 0x8b5   :  { %vm797_vm11 = vcmp.ge.f32.partialorder %v794_v22, 0.0  ;;  %v798_v24 = vmul.f32 0.01, %v794_v22 }
 0x8b7   :  { %v799_v25 = vsel %vm797_vm11, %v794_v22, %v798_v24 }
 0x8b8   :  { %1073 = vmatmul.mubr.msk.f32.vlgmr.msra.gmra.mrb[8].mxu0 %vm120_vm2, %v799_v25 }
 0x98b   :  { %v877_v27 = vpop.f32.mrb[8].mxu0 }
 0x98c   :  { %v878_v28 = vadd.f32 %v877_v27, %v807_v26  ;;  %v1074_v29 = vpop.f32.mrb[9].mxu0 }
 0x98e   :  { %v882_v30 = vmul.f32 0.01, %v878_v28  ;;  %vm881_vm12 = vcmp.ge.f32.partialorder %v878_v28, 0.0 }
 0x990   :  { %v883_v14 = vsel %vm881_vm12, %v878_v28, %v882_v30 }
 0x991   :  { %884 = vst.msk [vmem:[#allocation2] sm:$0xf] %vm22_vm3, %v883_v14 }
 0x992   :  { %1158 = shalt.err (!%p1155_p4)
}
 0x993   :  { %s1159_s27 = scalar_lea.hbm %s1436_s4, 64 }
 0x994   :  { %p1160_p5 = scmp.ne.s32.totalorder %s1436_s4, %s1159_s27  ;;  %p1163_p6 = scmp.lt.u32.totalorder %s1159_s27, %s1436_s4 }
 0x996   :  { %p1165_p7 = pnand %p1163_p6, %p1160_p5 }
 0x998   :  { %1168 = shalt.err (!%p1165_p7)
}
 0x999   :  { %894 = dma.vmem_to_hbm [thread:$0]  %s892_s24, 64, %s1436_s4, [#allocation3]  }
 0x99a   :  { %1169 = dma.done.wait [#allocation3], 64  }
 0x99b   :  { %1170 = vsyncadd [#allocation3], 4294967232 }
 0x99c   :  { %898 = vsyncpa [#allocation3], 1 }

</bundles_post_ra>
